<compile_context>
chip_gen: v6e
topology: v6e:2x2x1
jax: 0.10.0
libtpu: 0.0.40
codegen_flags: <defaults>
</compile_context>

<pallas_src>
import functools

import jax
import jax.numpy as jnp
from jax.experimental import pallas as pl
from jax.experimental.pallas import tpu as pltpu


def _round_up(x, m):
    return ((x + m - 1) // m) * m


# ---------------------------------------------------------------------------
# Fused kernel: embedding lookup + all GRU layers for one timestep.
#   tok_ref : (B, 1)        int32   token ids
#   emb_ref : (V, E)        f32     embedding table
#   w_ref   : (L, 2, K, 3H) f32     [l, 0]=W_ih^T (zero-padded to K rows),
#                                   [l, 1]=W_hh^T ; gate order (r, z, n)
#   b_ref   : (L, 2, 1, 3H) f32     [l, 0]=b_ih, [l, 1]=b_hh
#   h0_ref  : (L, B, H)     f32     previous hidden state
#   hid_ref : (PAD_R, PAD_L) f32    output slab; row l*B+b, cols 0:H hold h'_l
# ---------------------------------------------------------------------------
def _encoder_gru_kernel(tok_ref, emb_ref, w_ref, b_ref, h0_ref, hid_ref, *,
                        num_layers, hidden_size):
    B = tok_ref.shape[0]
    V = emb_ref.shape[0]
    H = hidden_size
    K = w_ref.shape[2]                      # packed contraction dim = max(E, H)

    # Embedding gather as a one-hot MXU matmul (no dynamic sublane indexing).
    toks = tok_ref[...]                                               # (B, 1)
    onehot = (jax.lax.broadcasted_iota(jnp.int32, (B, V), 1) == toks)
    x = jnp.dot(onehot.astype(jnp.float32), emb_ref[...],
                preferred_element_type=jnp.float32)                   # (B, E)

    new_rows = []
    for l in range(num_layers):                  # static Python loop (L small)
        h = h0_ref[l].astype(jnp.float32)                             # (B, H)

        # Zero-pad inputs up to K (no-op when E == H == K; weights padded too).
        x_k = x if x.shape[1] == K else jnp.concatenate(
            [x, jnp.zeros((B, K - x.shape[1]), jnp.float32)], axis=1)
        h_k = h if H == K else jnp.concatenate(
            [h, jnp.zeros((B, K - H), jnp.float32)], axis=1)

        # Two MXU pushes back-to-back, then VPU gate math.
        gi = jnp.dot(x_k, w_ref[l, 0], preferred_element_type=jnp.float32)
        gh = jnp.dot(h_k, w_ref[l, 1], preferred_element_type=jnp.float32)
        gi = gi + b_ref[l, 0]                                         # (B, 3H)
        gh = gh + b_ref[l, 1]                                         # (B, 3H)

        r = jax.nn.sigmoid(gi[:, 0:H] + gh[:, 0:H])
        z = jax.nn.sigmoid(gi[:, H:2 * H] + gh[:, H:2 * H])
        n = jnp.tanh(gi[:, 2 * H:3 * H] + r * gh[:, 2 * H:3 * H])
        h_new = n + z * (h - n)                  # == (1 - z) * n + z * h
        new_rows.append(h_new)
        x = h_new          # dropout = 0.0 / eval -> no inter-layer dropout

    # Lane-dense padded output slab: one full unmasked (8,128) store.
    hid = jnp.concatenate(new_rows, axis=0)                           # (L*B, H)
    pad_r = hid_ref.shape[0] - hid.shape[0]
    pad_l = hid_ref.shape[1] - hid.shape[1]
    if pad_r:
        hid = jnp.concatenate(
            [hid, jnp.zeros((pad_r, hid.shape[1]), jnp.float32)], axis=0)
    if pad_l:
        hid = jnp.concatenate(
            [hid, jnp.zeros((hid.shape[0], pad_l), jnp.float32)], axis=1)
    hid_ref[...] = hid


# ---------------------------------------------------------------------------
# Wrapper: single fused pallas_call, then cheap slicing back to (L, B, H).
# ---------------------------------------------------------------------------
def encoder_forward(params, token_ids, hidden):
    """
    token_ids : (B,) int32
    hidden    : (L, B, H) float32
    returns   : output (1, B, H), new_hidden (L, B, H)
    """
    emb, w, b = params["embedding"], params["w"], params["b"]
    L, B, H = hidden.shape
    V, E = emb.shape
    K = w.shape[2]

    pad_r = max(8, _round_up(L * B, 8))
    pad_c = max(128, _round_up(H, 128))

    flops = 2 * B * V * E + L * 2 * (2 * B * K * 3 * H)
    bytes_accessed = 4 * (emb.size + w.size + b.size + hidden.size
                          + token_ids.size + pad_r * pad_c)
    cost = pl.CostEstimate(flops=flops,
                           transcendentals=L * B * 3 * H,
                           bytes_accessed=int(bytes_accessed))

    vmem = pl.BlockSpec(memory_space=pltpu.MemorySpace.VMEM)
    hid_pad = pl.pallas_call(
        functools.partial(_encoder_gru_kernel, num_layers=L, hidden_size=H),
        out_shape=jax.ShapeDtypeStruct((pad_r, pad_c), jnp.float32),
        in_specs=[vmem] * 5,
        out_specs=vmem,
        compiler_params=pltpu.CompilerParams(vmem_limit_bytes=8 * 1024 * 1024),
        cost_estimate=cost,
    )(token_ids.reshape(B, 1).astype(jnp.int32), emb, w, b, hidden)

    new_hidden = hid_pad[:L * B, :H].reshape(L, B, H)
    output = new_hidden[L - 1][None, :, :]                            # (1, B, H)
    return output, new_hidden


# ---------------------------------------------------------------------------
# Deterministic params (mirrors nn.Embedding + nn.GRU shapes), packed/stacked.
# ---------------------------------------------------------------------------
def init_params(key, vocab_size, embedding_size, hidden_size, num_layers):
    E, H = embedding_size, hidden_size
    K = max(E, H)
    keys = jax.random.split(key, 1 + 4 * num_layers)
    embedding = jax.random.normal(keys[0], (vocab_size, E), jnp.float32)
    k = 1.0 / jnp.sqrt(hidden_size)
    w_layers, b_layers = [], []
    for l in range(num_layers):
        in_sz = E if l == 0 else H
        kw = keys[1 + 4 * l: 1 + 4 * (l + 1)]
        # PyTorch shapes: weight_ih (3H, in), weight_hh (3H, H), biases (3H,)
        wih = jax.random.uniform(kw[0], (3 * H, in_sz), jnp.float32, -k, k)
        whh = jax.random.uniform(kw[1], (3 * H, H), jnp.float32, -k, k)
        bih = jax.random.uniform(kw[2], (3 * H,), jnp.float32, -k, k)
        bhh = jax.random.uniform(kw[3], (3 * H,), jnp.float32, -k, k)
        # Pre-transpose for MXU and zero-pad contraction dim to K.
        wih_t = jnp.zeros((K, 3 * H), jnp.float32).at[:in_sz].set(wih.T)
        whh_t = jnp.zeros((K, 3 * H), jnp.float32).at[:H].set(whh.T)
        w_layers.append(jnp.stack([wih_t, whh_t], axis=0))             # (2, K, 3H)
        b_layers.append(jnp.stack([bih.reshape(1, -1),
                                   bhh.reshape(1, -1)], axis=0))       # (2, 1, 3H)
    return {
        "embedding": embedding,                     # (V, E)
        "w": jnp.stack(w_layers, axis=0),           # (L, 2, K, 3H)
        "b": jnp.stack(b_layers, axis=0),           # (L, 2, 1, 3H)
    }


# Pure-JAX reference (PyTorch GRU eval semantics) for correctness check.
def encoder_reference(params, token_ids, hidden):
    emb, w, b = params["embedding"], params["w"], params["b"]
    L, B, H = hidden.shape
    K = w.shape[2]
    x = jnp.take(emb, token_ids, axis=0)
    new_h = []
    for l in range(L):
        h = hidden[l]
        x_k = jnp.pad(x, ((0, 0), (0, K - x.shape[1])))
        h_k = jnp.pad(h, ((0, 0), (0, K - H)))
        gi = x_k @ w[l, 0] + b[l, 0, 0]
        gh = h_k @ w[l, 1] + b[l, 1, 0]
        r = jax.nn.sigmoid(gi[:, :H] + gh[:, :H])
        z = jax.nn.sigmoid(gi[:, H:2 * H] + gh[:, H:2 * H])
        n = jnp.tanh(gi[:, 2 * H:] + r * gh[:, 2 * H:])
        h_new = (1.0 - z) * n + z * h
        new_h.append(h_new)
        x = h_new
    return x[None], jnp.stack(new_h, axis=0)


if __name__ == "__main__":
    VOCAB, EMB, HID, LAYERS, BATCH = 16, 32, 32, 2, 2

    key = jax.random.PRNGKey(0)
    pkey, ikey = jax.random.split(key)

    params = init_params(pkey, VOCAB, EMB, HID, LAYERS)
    token_ids = jax.random.randint(ikey, (BATCH,), 0, VOCAB, dtype=jnp.int32)
    hidden0 = jnp.zeros((LAYERS, BATCH, HID), jnp.float32)   # initHidden()

    fwd = jax.jit(encoder_forward)
    output, hidden = fwd(params, token_ids, hidden0)
    jax.block_until_ready((output, hidden))

    assert output.shape == (1, BATCH, HID)
    assert hidden.shape == (LAYERS, BATCH, HID)
    assert bool(jnp.all(jnp.isfinite(output))) and bool(jnp.all(jnp.isfinite(hidden)))

    out_ref, hid_ref = encoder_reference(params, token_ids, hidden0)
    assert bool(jnp.allclose(output, out_ref, atol=5e-3, rtol=0.0))
    assert bool(jnp.allclose(hidden, hid_ref, atol=5e-3, rtol=0.0))

    print("KERNEL_OK")
</pallas_src>

<mosaic_0001>
module attributes {stable_mosaic.version = 11 : i64} {
  func.func @_encoder_gru_kernel(%arg0: memref<2x1xi32, #tpu.memory_space<vmem>>, %arg1: memref<16x32xf32, #tpu.memory_space<vmem>>, %arg2: memref<2x2x32x96xf32, #tpu.memory_space<vmem>>, %arg3: memref<2x2x1x96xf32, #tpu.memory_space<vmem>>, %arg4: memref<2x2x32xf32, #tpu.memory_space<vmem>>, %arg5: memref<8x128xf32, #tpu.memory_space<vmem>>) attributes {dimension_semantics = [], scalar_prefetch = 0 : i64, scratch_operands = 0 : i64, tpu.core_type = #tpu.core_type<tc>} {
    %c0 = arith.constant 0 : index
    %c0_0 = arith.constant 0 : index
    %0 = vector.load %arg0[%c0, %c0_0] : memref<2x1xi32, #tpu.memory_space<vmem>>, vector<2x1xi32>
    %1 = tpu.iota {dimensions = array<i32: 1>} : vector<2x16xi32>
    %2 = vector.broadcast %0 : vector<2x1xi32> to vector<2x16xi32>
    %3 = arith.cmpi eq, %1, %2 : vector<2x16xi32>
    %4 = arith.extui %3 : vector<2x16xi1> to vector<2x16xi32>
    %5 = arith.sitofp %4 : vector<2x16xi32> to vector<2x16xf32>
    %c0_1 = arith.constant 0 : index
    %c0_2 = arith.constant 0 : index
    %6 = vector.load %arg1[%c0_1, %c0_2] : memref<16x32xf32, #tpu.memory_space<vmem>>, vector<16x32xf32>
    %cst = arith.constant dense<0.000000e+00> : vector<2x32xf32>
    %7 = tpu.matmul %5, %6, %cst {dimension_numbers = #tpu.dot_dimension_numbers<[1], [0], [0], [1], [0, 0, 1, 1], [], []>} : vector<2x16xf32>, vector<16x32xf32>, vector<2x32xf32> -> vector<2x32xf32>
    %c0_3 = arith.constant 0 : index
    %c0_4 = arith.constant 0 : index
    %c0_5 = arith.constant 0 : index
    %8 = vector.load %arg4[%c0_3, %c0_4, %c0_5] : memref<2x2x32xf32, #tpu.memory_space<vmem>>, vector<1x2x32xf32>
    %9 = vector.shape_cast %8 : vector<1x2x32xf32> to vector<2x32xf32>
    %c0_6 = arith.constant 0 : index
    %c0_7 = arith.constant 0 : index
    %c0_8 = arith.constant 0 : index
    %c0_9 = arith.constant 0 : index
    %10 = vector.load %arg2[%c0_6, %c0_7, %c0_8, %c0_9] : memref<2x2x32x96xf32, #tpu.memory_space<vmem>>, vector<1x1x32x96xf32>
    %11 = vector.shape_cast %10 : vector<1x1x32x96xf32> to vector<32x96xf32>
    %cst_10 = arith.constant dense<0.000000e+00> : vector<2x96xf32>
    %12 = tpu.matmul %7, %11, %cst_10 {dimension_numbers = #tpu.dot_dimension_numbers<[1], [0], [0], [1], [0, 0, 1, 1], [], []>} : vector<2x32xf32>, vector<32x96xf32>, vector<2x96xf32> -> vector<2x96xf32>
    %c0_11 = arith.constant 0 : index
    %c1 = arith.constant 1 : index
    %c0_12 = arith.constant 0 : index
    %c0_13 = arith.constant 0 : index
    %13 = vector.load %arg2[%c0_11, %c1, %c0_12, %c0_13] : memref<2x2x32x96xf32, #tpu.memory_space<vmem>>, vector<1x1x32x96xf32>
    %14 = vector.shape_cast %13 : vector<1x1x32x96xf32> to vector<32x96xf32>
    %cst_14 = arith.constant dense<0.000000e+00> : vector<2x96xf32>
    %15 = tpu.matmul %9, %14, %cst_14 {dimension_numbers = #tpu.dot_dimension_numbers<[1], [0], [0], [1], [0, 0, 1, 1], [], []>} : vector<2x32xf32>, vector<32x96xf32>, vector<2x96xf32> -> vector<2x96xf32>
    %c0_15 = arith.constant 0 : index
    %c0_16 = arith.constant 0 : index
    %c0_17 = arith.constant 0 : index
    %c0_18 = arith.constant 0 : index
    %16 = vector.load %arg3[%c0_15, %c0_16, %c0_17, %c0_18] : memref<2x2x1x96xf32, #tpu.memory_space<vmem>>, vector<1x1x1x96xf32>
    %17 = vector.shape_cast %16 : vector<1x1x1x96xf32> to vector<1x96xf32>
    %18 = vector.broadcast %17 : vector<1x96xf32> to vector<2x96xf32>
    %19 = arith.addf %12, %18 : vector<2x96xf32>
    %c0_19 = arith.constant 0 : index
    %c1_20 = arith.constant 1 : index
    %c0_21 = arith.constant 0 : index
    %c0_22 = arith.constant 0 : index
    %20 = vector.load %arg3[%c0_19, %c1_20, %c0_21, %c0_22] : memref<2x2x1x96xf32, #tpu.memory_space<vmem>>, vector<1x1x1x96xf32>
    %21 = vector.shape_cast %20 : vector<1x1x1x96xf32> to vector<1x96xf32>
    %22 = vector.broadcast %21 : vector<1x96xf32> to vector<2x96xf32>
    %23 = arith.addf %15, %22 : vector<2x96xf32>
    %24 = vector.extract_strided_slice %19 {offsets = [0, 0], sizes = [2, 32], strides = [1, 1]} : vector<2x96xf32> to vector<2x32xf32>
    %25 = vector.extract_strided_slice %23 {offsets = [0, 0], sizes = [2, 32], strides = [1, 1]} : vector<2x96xf32> to vector<2x32xf32>
    %26 = arith.addf %24, %25 : vector<2x32xf32>
    %27 = arith.negf %26 : vector<2x32xf32>
    %28 = math.exp %27 : vector<2x32xf32>
    %cst_23 = arith.constant 1.000000e+00 : f32
    %29 = vector.broadcast %cst_23 : f32 to vector<2x32xf32>
    %30 = arith.addf %29, %28 : vector<2x32xf32>
    %31 = arith.divf %29, %30 : vector<2x32xf32>
    %32 = vector.extract_strided_slice %19 {offsets = [0, 32], sizes = [2, 32], strides = [1, 1]} : vector<2x96xf32> to vector<2x32xf32>
    %33 = vector.extract_strided_slice %23 {offsets = [0, 32], sizes = [2, 32], strides = [1, 1]} : vector<2x96xf32> to vector<2x32xf32>
    %34 = arith.addf %32, %33 : vector<2x32xf32>
    %35 = arith.negf %34 : vector<2x32xf32>
    %36 = math.exp %35 : vector<2x32xf32>
    %cst_24 = arith.constant 1.000000e+00 : f32
    %37 = vector.broadcast %cst_24 : f32 to vector<2x32xf32>
    %38 = arith.addf %37, %36 : vector<2x32xf32>
    %39 = arith.divf %37, %38 : vector<2x32xf32>
    %40 = vector.extract_strided_slice %19 {offsets = [0, 64], sizes = [2, 32], strides = [1, 1]} : vector<2x96xf32> to vector<2x32xf32>
    %41 = vector.extract_strided_slice %23 {offsets = [0, 64], sizes = [2, 32], strides = [1, 1]} : vector<2x96xf32> to vector<2x32xf32>
    %42 = arith.mulf %31, %41 : vector<2x32xf32>
    %43 = arith.addf %40, %42 : vector<2x32xf32>
    %44 = math.tanh %43 : vector<2x32xf32>
    %45 = arith.subf %9, %44 : vector<2x32xf32>
    %46 = arith.mulf %39, %45 : vector<2x32xf32>
    %47 = arith.addf %44, %46 : vector<2x32xf32>
    %c1_25 = arith.constant 1 : index
    %c0_26 = arith.constant 0 : index
    %c0_27 = arith.constant 0 : index
    %48 = vector.load %arg4[%c1_25, %c0_26, %c0_27] : memref<2x2x32xf32, #tpu.memory_space<vmem>>, vector<1x2x32xf32>
    %49 = vector.shape_cast %48 : vector<1x2x32xf32> to vector<2x32xf32>
    %c1_28 = arith.constant 1 : index
    %c0_29 = arith.constant 0 : index
    %c0_30 = arith.constant 0 : index
    %c0_31 = arith.constant 0 : index
    %50 = vector.load %arg2[%c1_28, %c0_29, %c0_30, %c0_31] : memref<2x2x32x96xf32, #tpu.memory_space<vmem>>, vector<1x1x32x96xf32>
    %51 = vector.shape_cast %50 : vector<1x1x32x96xf32> to vector<32x96xf32>
    %cst_32 = arith.constant dense<0.000000e+00> : vector<2x96xf32>
    %52 = tpu.matmul %47, %51, %cst_32 {dimension_numbers = #tpu.dot_dimension_numbers<[1], [0], [0], [1], [0, 0, 1, 1], [], []>} : vector<2x32xf32>, vector<32x96xf32>, vector<2x96xf32> -> vector<2x96xf32>
    %c1_33 = arith.constant 1 : index
    %c1_34 = arith.constant 1 : index
    %c0_35 = arith.constant 0 : index
    %c0_36 = arith.constant 0 : index
    %53 = vector.load %arg2[%c1_33, %c1_34, %c0_35, %c0_36] : memref<2x2x32x96xf32, #tpu.memory_space<vmem>>, vector<1x1x32x96xf32>
    %54 = vector.shape_cast %53 : vector<1x1x32x96xf32> to vector<32x96xf32>
    %cst_37 = arith.constant dense<0.000000e+00> : vector<2x96xf32>
    %55 = tpu.matmul %49, %54, %cst_37 {dimension_numbers = #tpu.dot_dimension_numbers<[1], [0], [0], [1], [0, 0, 1, 1], [], []>} : vector<2x32xf32>, vector<32x96xf32>, vector<2x96xf32> -> vector<2x96xf32>
    %c1_38 = arith.constant 1 : index
    %c0_39 = arith.constant 0 : index
    %c0_40 = arith.constant 0 : index
    %c0_41 = arith.constant 0 : index
    %56 = vector.load %arg3[%c1_38, %c0_39, %c0_40, %c0_41] : memref<2x2x1x96xf32, #tpu.memory_space<vmem>>, vector<1x1x1x96xf32>
    %57 = vector.shape_cast %56 : vector<1x1x1x96xf32> to vector<1x96xf32>
    %58 = vector.broadcast %57 : vector<1x96xf32> to vector<2x96xf32>
    %59 = arith.addf %52, %58 : vector<2x96xf32>
    %c1_42 = arith.constant 1 : index
    %c1_43 = arith.constant 1 : index
    %c0_44 = arith.constant 0 : index
    %c0_45 = arith.constant 0 : index
    %60 = vector.load %arg3[%c1_42, %c1_43, %c0_44, %c0_45] : memref<2x2x1x96xf32, #tpu.memory_space<vmem>>, vector<1x1x1x96xf32>
    %61 = vector.shape_cast %60 : vector<1x1x1x96xf32> to vector<1x96xf32>
    %62 = vector.broadcast %61 : vector<1x96xf32> to vector<2x96xf32>
    %63 = arith.addf %55, %62 : vector<2x96xf32>
    %64 = vector.extract_strided_slice %59 {offsets = [0, 0], sizes = [2, 32], strides = [1, 1]} : vector<2x96xf32> to vector<2x32xf32>
    %65 = vector.extract_strided_slice %63 {offsets = [0, 0], sizes = [2, 32], strides = [1, 1]} : vector<2x96xf32> to vector<2x32xf32>
    %66 = arith.addf %64, %65 : vector<2x32xf32>
    %67 = arith.negf %66 : vector<2x32xf32>
    %68 = math.exp %67 : vector<2x32xf32>
    %cst_46 = arith.constant 1.000000e+00 : f32
    %69 = vector.broadcast %cst_46 : f32 to vector<2x32xf32>
    %70 = arith.addf %69, %68 : vector<2x32xf32>
    %71 = arith.divf %69, %70 : vector<2x32xf32>
    %72 = vector.extract_strided_slice %59 {offsets = [0, 32], sizes = [2, 32], strides = [1, 1]} : vector<2x96xf32> to vector<2x32xf32>
    %73 = vector.extract_strided_slice %63 {offsets = [0, 32], sizes = [2, 32], strides = [1, 1]} : vector<2x96xf32> to vector<2x32xf32>
    %74 = arith.addf %72, %73 : vector<2x32xf32>
    %75 = arith.negf %74 : vector<2x32xf32>
    %76 = math.exp %75 : vector<2x32xf32>
    %cst_47 = arith.constant 1.000000e+00 : f32
    %77 = vector.broadcast %cst_47 : f32 to vector<2x32xf32>
    %78 = arith.addf %77, %76 : vector<2x32xf32>
    %79 = arith.divf %77, %78 : vector<2x32xf32>
    %80 = vector.extract_strided_slice %59 {offsets = [0, 64], sizes = [2, 32], strides = [1, 1]} : vector<2x96xf32> to vector<2x32xf32>
    %81 = vector.extract_strided_slice %63 {offsets = [0, 64], sizes = [2, 32], strides = [1, 1]} : vector<2x96xf32> to vector<2x32xf32>
    %82 = arith.mulf %71, %81 : vector<2x32xf32>
    %83 = arith.addf %80, %82 : vector<2x32xf32>
    %84 = math.tanh %83 : vector<2x32xf32>
    %85 = arith.subf %49, %84 : vector<2x32xf32>
    %86 = arith.mulf %79, %85 : vector<2x32xf32>
    %87 = arith.addf %84, %86 : vector<2x32xf32>
    %88 = tpu.concatenate %47, %87 in 0 : vector<2x32xf32>, vector<2x32xf32> -> vector<4x32xf32>
    %cst_48 = arith.constant 0.000000e+00 : f32
    %89 = vector.broadcast %cst_48 : f32 to vector<4x32xf32>
    %90 = tpu.concatenate %88, %89 in 0 : vector<4x32xf32>, vector<4x32xf32> -> vector<8x32xf32>
    %cst_49 = arith.constant 0.000000e+00 : f32
    %91 = vector.broadcast %cst_49 : f32 to vector<8x96xf32>
    %92 = tpu.concatenate %90, %91 in 1 : vector<8x32xf32>, vector<8x96xf32> -> vector<8x128xf32>
    %c0_50 = arith.constant 0 : index
    %c0_51 = arith.constant 0 : index
    %93 = vector.load %arg5[%c0_50, %c0_51] : memref<8x128xf32, #tpu.memory_space<vmem>>, vector<8x128xf32>
    tpu.vector_store %arg5[%c0_50, %c0_51], %92 {strides = array<i32>} : memref<8x128xf32, #tpu.memory_space<vmem>>, vector<8x128xf32>,
    return
  }
}

</mosaic_0001>

<bundles_post_ra>
// kernel: encoder_forward.1
= control target key start
LH: loop header
LB: loop body
LE: loop exit
PB: predicated region body
PF: predicated region fallthrough
CT: control target
= control target key end

     0   :  { %10 = vsyncpa [#allocation3], 0  ;;  %s837_s0 = inlined_call_operand.vmem [shape: s32[2,1], index: 0, kind: input, shape index: {}]   ;;  %s838_s1 = inlined_call_operand.hbm [shape: f32[16,32], index: 1, kind: input, shape index: {}]   ;;  %s839_s2 = inlined_call_operand.hbm [shape: f32[2,2,32,96], index: 2, kind: input, shape index: {}]   ;;  %s840_s3 = inlined_call_operand.vmem [shape: f32[2,2,1,96], index: 3, kind: input, shape index: {}]   ;;  %s841_s4 = inlined_call_operand.vmem [shape: f32[2,2,32], index: 4, kind: input, shape index: {}]   ;;  %s842_s5 = inlined_call_operand.vmem [shape: f32[8,128], index: 5, kind: output, shape index: {}]  }
   0x1   :  { %11 = vsyncpa [#allocation5], 0  ;;  %s722_s18 = smov [#allocation2]  }
   0x2   :  { %s19_s19 = sshll.u32 %s722_s18, 4  ;;  %s20_s19 = int_to_ptr.vmem [resolvable:$true] %s19_s19 }
   0x3   :  { %s686_s20 = scalar_lea.vmem %s20_s19, 256  ;;  %p691_p1 = scmp.lt.s32.totalorder %s20_s19, %s20_s19 }
   0x4   :  { %p687_p0 = scmp.ne.s32.totalorder %s20_s19, %s686_s20  ;;  %p692_p2 = scmp.lt.s32.totalorder %s686_s20, %s686_s20 }
   0x6   :  { %p693_p3 = por %p692_p2, %p691_p1 }
   0x8   :  { %p694_p4 = pnand %p693_p3, %p687_p0 }
   0xa   :  { %697 = shalt.err (!%p694_p4)
}
   0xb   :  { %s723_s21 = smov 128   ;;  %s724_s22 = smov 8  }
   0xc   :  { %25 = dma.hbm_to_vmem [thread:$0]  %s838_s1, 256, %s20_s19, [#allocation3], %s723_s21, %s723_s21, %s724_s22  }
   0xd   :  { %s725_s25 = smov [#allocation4]  }
   0xe   :  { %s31_s26 = sshll.u32 %s725_s25, 4  ;;  %s32_s26 = int_to_ptr.vmem [resolvable:$true] %s31_s26 }
   0xf   :  { %s706_s27 = scalar_lea.vmem %s32_s26, 2048  ;;  %p711_p6 = scmp.lt.s32.totalorder %s32_s26, %s32_s26 }
  0x10   :  { %p707_p5 = scmp.ne.s32.totalorder %s32_s26, %s706_s27  ;;  %p712_p7 = scmp.lt.s32.totalorder %s706_s27, %s706_s27 }
  0x12   :  { %p713_p8 = por %p712_p7, %p711_p6 }
  0x14   :  { %p714_p9 = pnand %p713_p8, %p707_p5 }
  0x16   :  { %717 = shalt.err (!%p714_p9)
}
  0x17   :  { %37 = dma.hbm_to_vmem [thread:$0]  %s839_s2, 2048, %s32_s26, [#allocation5], %s723_s21, %s723_s21, %s724_s22  }
  0x18   :  { %718 = dma.done.wait [#allocation3], 256  }
  0x19   :  { %719 = vsyncadd [#allocation3], 4294967040 }
  0x1a   :  { %720 = dma.done.wait [#allocation5], 2048  }
  0x1b   :  { %721 = vsyncadd [#allocation5], 4294965248  ;;  %v726_v0 = vmov 0   ;;  %v727_v1 = vmov 0.0   ;;  %vm728_vm0 = vmmov 0   ;;  %v58_v3 = vld [vmem:[#allocation2 + $0x8] sm:$0xff]  ;;  %v49_v8 = vlaneseq }
  0x1c   :  { %665 = vset.pattern.permute.xlu0 %v726_v0  ;;  %605 = vmatprep.subr.mxu0 %v727_v1  ;;  %v48_v2 = vld [vmem:[%s837_s0] sm:$0x3]  ;;  %v137_v5 = vld [vmem:[#allocation4 + $0x18] sm:$0xff]  ;;  %v135_v7 = vld [vmem:[#allocation4 + $0x8] sm:$0xff]  ;;  %vm59_vm1 = vcmask 130048   ;;  %vm150_vm3 = vcmask 261120  }
  0x1d   :  { %612 = vmatprep.subr.mxu1 %v727_v1  ;;  %609 = vmatprep.mubr.msk.f32.mxu0 %vm728_vm0, %v727_v1  ;;  %v57_v4 = vld [vmem:[#allocation2] sm:$0xff]  ;;  %v50_v9 = vand.u32 127, %v49_v8  ;;  %v142_v11 = vld [vmem:[#allocation4 + $0x38] sm:$0xff]  ;;  %v140_v14 = vld [vmem:[#allocation4 + $0x28] sm:$0xff]  ;;  %s729_s8 = smov 64   ;;  %s730_s11 = smov 32  }
  0x1e   :  { %620 = vmatprep.mubr.msk.f32.mxu1 %vm728_vm0, %v727_v1  ;;  %52 = vperm.xlu0 %665, %v48_v2   ;;  %v136_v6 = vld [vmem:[#allocation4 + $0x10] sm:$0xff]  ;;  %v139_v15 = vld [vmem:[#allocation4 + $0x20] sm:$0xff]  ;;  %v349_v40 = vld [vmem:[#allocation4 + $0x78] sm:$0xff]  ;;  %vm550_vm4 = vcmask 1041408   ;;  %vm552_vm5 = vcmask 1043456  }
  0x1f   :  { %606 = vmatpush3.msra.mxu0 %v58_v3  ;;  %613 = vmatpush3.msra.mxu1 %v137_v5  ;;  %v141_v13 = vld [vmem:[#allocation4 + $0x30] sm:$0xff]  ;;  %v134_v17 = vld [vmem:[#allocation4] sm:$0xff]  ;;  %v344_v42 = vld [vmem:[#allocation4 + $0x58] sm:$0xff] }
  0x20   :  { %607 = vmatprep.subr.mxu0 %v727_v1  ;;  %614 = vmatprep.subr.mxu1 %v727_v1  ;;  %v133_v16 = vld [vmem:[%s841_s4] sm:$0x3]  ;;  %v347_v43 = vld [vmem:[#allocation4 + $0x68] sm:$0xff]  ;;  %v346_v46 = vld [vmem:[#allocation4 + $0x60] sm:$0xff] }
  0x21   :  { %608 = vmatpush3.msra.mxu0 %v57_v4  ;;  %615 = vmatpush3.msra.mxu1 %v136_v6  ;;  %v571_v20 = vld [vmem:[%s840_s3 + $0x1] ss:$0 sm:$0xff]  ;;  %v568_v24 = vld [vmem:[%s840_s3] ss:$0 sm:$0xff]  ;;  %v342_v45 = vld [vmem:[#allocation4 + $0x48] sm:$0xff] }
  0x22   :  { %623 = vmatprep.subr.mxu0 %v727_v1  ;;  %616 = vmatprep.subr.mxu1 %v727_v1  ;;  %v348_v41 = vld [vmem:[#allocation4 + $0x70] sm:$0xff]  ;;  %v341_v48 = vld [vmem:[#allocation4 + $0x40] sm:$0xff] }
  0x23   :  { %617 = vmatpush3.msra.mxu1 %v135_v7  ;;  %v343_v44 = vld [vmem:[#allocation4 + $0x50] sm:$0xff] }
  0x24   :  { %618 = vmatprep.subr.mxu1 %v727_v1  ;;  %v574_v47 = vld [vmem:[%s841_s4 + $0x2] sm:$0x3] }
  0x25   :  { %619 = vmatpush3.msra.mxu1 %v134_v17  ;;  %v579_v53 = vld [vmem:[%s840_s3 + $0x3] ss:$0 sm:$0xff]  ;;  %v576_v58 = vld [vmem:[%s840_s3 + $0x2] ss:$0 sm:$0xff] }
  0x26   :  { %634 = vmatprep.subr.mxu1 %v727_v1 }
  0x99   :  { %v53_v10 = vpop.permute.xlu0 %52 }
  0x9a   :  { %vm54_vm2 = vcmp.eq.s32.totalorder %v50_v9, %v53_v10 }
  0x9b   :  { %v566_v12 = vsel %vm54_vm2, 1.0, %v727_v1 }
  0x9c   :  { %610 = vmatmul.mubr.msk.f32.vlgmr.msra.gmra.mxu0 %vm59_vm1, %v566_v12 }
  0x9d   :  { %624 = vmatpush3.msra.mxu0 %v142_v11  ;;  %631 = vmatprep.mubr.msk.f32.mxu0 %vm728_vm0, %v727_v1 }
  0x9e   :  { %625 = vmatprep.subr.mxu0 %v727_v1 }
  0x9f   :  { %626 = vmatpush3.msra.mxu0 %v141_v13 }
  0xa0   :  { %627 = vmatprep.subr.mxu0 %v727_v1 }
  0xa1   :  { %628 = vmatpush3.msra.mxu0 %v140_v14 }
  0xa2   :  { %629 = vmatprep.subr.mxu0 %v727_v1 }
  0xa3   :  { %630 = vmatpush3.msra.mxu0 %v139_v15 }
  0xa4   :  { %632 = vmatmul.mubr.msk.f32.vlgmr.msra.gmra.mxu0 %vm150_vm3, %v133_v16  ;;  %645 = vmatprep.subr.mxu0 %v727_v1 }
  0xa5   :  { %653 = vmatprep.mubr.msk.f32.mxu0 %vm728_vm0, %v727_v1  ;;  %646 = vmatpush3.msra.mxu0 %v349_v40 }
  0xa6   :  { %647 = vmatprep.subr.mxu0 %v727_v1 }
  0xa7   :  { %648 = vmatpush3.msra.mxu0 %v348_v41 }
  0xa8   :  { %649 = vmatprep.subr.mxu0 %v727_v1 }
  0xa9   :  { %650 = vmatpush3.msra.mxu0 %v347_v43 }
  0xaa   :  { %651 = vmatprep.subr.mxu0 %v727_v1 }
  0xab   :  { %652 = vmatpush3.msra.mxu0 %v346_v46 }
  0xac   :  { %654 = vmatmul.mubr.msk.f32.vlgmr.msra.gmra.mxu0 %vm150_vm3, %v574_v47 }
 0x15c   :  { %v129_v18 = vpop.f32.mrf.mxu0 }
 0x15d   :  { %621 = vmatmul.mubr.msk.f32.vlgmr.msra.gmra.mxu1 %vm150_vm3, %v129_v18 }
 0x15e   :  { %v611_v19 = vpop.f32.mrf.mxu0  ;;  %642 = vmatprep.mubr.msk.f32.mxu1 %vm728_vm0, %v727_v1  ;;  %635 = vmatpush3.msra.mxu1 %v344_v42 }
 0x15f   :  { %636 = vmatprep.subr.mxu1 %v727_v1 }
 0x160   :  { %637 = vmatpush3.msra.mxu1 %v343_v44 }
 0x161   :  { %638 = vmatprep.subr.mxu1 %v727_v1 }
 0x162   :  { %639 = vmatpush3.msra.mxu1 %v342_v45 }
 0x163   :  { %640 = vmatprep.subr.mxu1 %v727_v1 }
 0x164   :  { %v301_v21 = vpop.f32.mrf.mxu0  ;;  %641 = vmatpush3.msra.mxu1 %v341_v48 }
 0x165   :  { %v302_v22 = vadd.f32 %v571_v20, %v301_v21 }
 0x166   :  { %v633_v23 = vpop.f32.mrf.mxu0 }
 0x167   :  { %313 = vrot.lane.b32.xlu0 %v302_v22, %s729_s8 }
 0x16c   :  { %v510_v54 = vpop.f32.mrf.mxu0 }
 0x16d   :  { %v511_v55 = vadd.f32 %v579_v53, %v510_v54 }
 0x16e   :  { %v655_v56 = vpop.f32.mrf.mxu0 }
 0x1d9   :  { %v314_v32 = vpop.permute.xlu0 %313 }
 0x21d   :  { %v220_v25 = vpop.f32.mrf.mxu1 }
 0x21e   :  { %v221_v26 = vadd.f32 %v568_v24, %v220_v25 }
 0x21f   :  { %v622_v27 = vpop.f32.mrf.mxu1 }
 0x220   :  { %v305_v28 = vadd.f32 %v302_v22, %v221_v26 }
 0x222   :  { %v573_v29 = vmul.f32 -1.442695, %v305_v28 }
 0x224   :  { %666 = vpow2.f32 %v573_v29 }
 0x231   :  { %v667_v30 = vpop.eup %666 }
 0x232   :  { %v309_v31 = vadd.f32 1.0, %v667_v30 }
 0x234   :  { %668 = vrcp.f32 %v309_v31 }
 0x241   :  { %v669_v33 = vpop.eup %668 }
 0x242   :  { %v316_v34 = vmul.f32 %v669_v33, %v314_v32 }
 0x244   :  { %318 = vrot.lane.b32.xlu1 %v316_v34, %s729_s8 }
 0x2b6   :  { %v319_v35 = vpop.permute.xlu1 %318 }
 0x2b7   :  { %v321_v36 = vadd.f32 %v319_v35, %v221_v26 }
 0x2b9   :  { %670 = vtanh.f32 %v321_v36 }
 0x2c6   :  { %v671_v37 = vpop.eup %670 }
 0x2c7   :  { %324 = vrot.lane.b32.xlu1 %v671_v37, %s729_s8 }
 0x339   :  { %v325_v38 = vpop.permute.xlu1 %324 }
 0x33a   :  { %v327_v39 = vsub.f32 %v133_v16, %v325_v38 }
 0x33c   :  { %329 = vrot.lane.b32.xlu0 %v327_v39, %s730_s11 }
 0x3ae   :  { %v330_v49 = vpop.permute.xlu0 %329 }
 0x3af   :  { %v332_v50 = vmul.f32 %v669_v33, %v330_v49 }
 0x3b1   :  { %334 = vrot.lane.b32.xlu1 %v332_v50, %s730_s11 }
 0x3b5   :  { %522 = vrot.lane.b32.xlu1 %v511_v55, %s729_s8 }
 0x423   :  { %v335_v51 = vpop.permute.xlu1 %334 }
 0x424   :  { %v337_v52 = vadd.f32 %v671_v37, %v335_v51 }
 0x426   :  { %359 = vrot.lane.b32.xlu0 %v337_v52, %s729_s8 }
 0x427   :  { %v523_v2 = vpop.permute.xlu1 %522 }
 0x498   :  { %v360_v57 = vpop.permute.xlu0 %359 }
 0x499   :  { %643 = vmatmul.mubr.msk.f32.vlgmr.msra.gmra.mxu1 %vm150_vm3, %v360_v57 }
 0x559   :  { %v429_v59 = vpop.f32.mrf.mxu1 }
 0x55a   :  { %v430_v60 = vadd.f32 %v576_v58, %v429_v59 }
 0x55b   :  { %v644_v61 = vpop.f32.mrf.mxu1 }
 0x55c   :  { %v514_v62 = vadd.f32 %v511_v55, %v430_v60 }
 0x55e   :  { %v581_v63 = vmul.f32 -1.442695, %v514_v62 }
 0x560   :  { %672 = vpow2.f32 %v581_v63 }
 0x56d   :  { %v673_v0 = vpop.eup %672 }
 0x56e   :  { %v518_v1 = vadd.f32 1.0, %v673_v0 }
 0x570   :  { %674 = vrcp.f32 %v518_v1 }
 0x57d   :  { %v675_v3 = vpop.eup %674 }
 0x57e   :  { %v525_v4 = vmul.f32 %v675_v3, %v523_v2 }
 0x580   :  { %527 = vrot.lane.b32.xlu0 %v525_v4, %s729_s8 }
 0x5f2   :  { %v528_v5 = vpop.permute.xlu0 %527 }
 0x5f3   :  { %v530_v6 = vadd.f32 %v528_v5, %v430_v60 }
 0x5f5   :  { %676 = vtanh.f32 %v530_v6 }
 0x602   :  { %v677_v7 = vpop.eup %676 }
 0x603   :  { %533 = vrot.lane.b32.xlu1 %v677_v7, %s729_s8 }
 0x675   :  { %v534_v8 = vpop.permute.xlu1 %533 }
 0x676   :  { %v536_v9 = vsub.f32 %v574_v47, %v534_v8 }
 0x678   :  { %538 = vrot.lane.b32.xlu0 %v536_v9, %s730_s11 }
 0x6ea   :  { %v539_v10 = vpop.permute.xlu0 %538 }
 0x6eb   :  { %v541_v11 = vmul.f32 %v675_v3, %v539_v10 }
 0x6ed   :  { %543 = vrot.lane.b32.xlu1 %v541_v11, %s730_s11 }
 0x75f   :  { %v544_v12 = vpop.permute.xlu1 %543 }
 0x760   :  { %v546_v13 = vadd.f32 %v677_v7, %v544_v12 }
 0x762   :  { %v548_v14 = vrot.slane %v546_v13, 6 }
 0x764   :  { %v551_v15 = vsel %vm550_vm4, %v337_v52, %v548_v14 }
 0x765   :  { %v553_v16 = vsel %vm552_vm5, %v551_v15, 0.0 }
 0x766   :  { %555 = vrot.lane.b32.xlu0 %v553_v16, %s729_s8 }
 0x7d8   :  { %v556_v17 = vpop.permute.xlu0 %555 }
 0x7d9   :  { %v558_v18 = vsel %vm150_vm3, %v556_v17, 0.0 }
 0x7da   :  { %559 = vst [vmem:[%s842_s5] sm:$0xff] %v558_v18 }
 0x7db   :  { %564 = vsyncpa [#allocation3], 1 }
 0x7dc   :  { %565 = vsyncpa [#allocation5], 1 }

</bundles_post_ra>
